<compile_context>
chip_gen: v5e
topology: v5e:2x2
jax: 0.10.0
libtpu: 0.0.40
codegen_flags: <defaults>
</compile_context>

<pallas_src>
import jax
import jax.numpy as jnp
from jax.experimental import pallas as pl
from jax.experimental.pallas import tpu as pltpu


def _linear_kernel(x_ref, w_ref, b_ref, o_ref):
    # x_ref: (TM, F)   w_ref: (F, C)   b_ref: (1, C)   o_ref: (TM, C)
    acc = jnp.dot(x_ref[...], w_ref[...], preferred_element_type=jnp.float32)
    o_ref[...] = (acc + b_ref[...].astype(jnp.float32)).astype(o_ref.dtype)


def classifier_forward(x, weight, bias):
    """Forward pass of `classifier`.

    x:      (batch, ...) — flattened to (batch, F) inside, F = prod(trailing dims)
    weight: (num_classes, F)  — PyTorch nn.Linear layout
    bias:   (num_classes,)
    returns (batch, num_classes)
    """
    batch = x.shape[0]
    x_flat = x.reshape(batch, -1)                 # lane-dense 2D slab
    F = x_flat.shape[1]
    num_classes = weight.shape[0]

    # Layout plumbing in the wrapper (not in the kernel hot path):
    w = weight.T                                  # (F, num_classes)
    b = bias.reshape(1, num_classes)              # (1, num_classes)

    # Tile only the batch dim. Block either equals the full dim (always legal)
    # or is a multiple of 8 for larger batches; F / num_classes blocks equal
    # the full array dims, so the (8,128) constraint is trivially satisfied.
    if batch <= 128:
        block_m = batch
    else:
        block_m = 128
    grid_m = pl.cdiv(batch, block_m)

    return pl.pallas_call(
        _linear_kernel,
        out_shape=jax.ShapeDtypeStruct((batch, num_classes), x.dtype),
        grid=(grid_m,),
        in_specs=[
            pl.BlockSpec((block_m, F), lambda i: (i, 0)),      # x tile per step
            pl.BlockSpec((F, num_classes), lambda i: (0, 0)),  # full weight, reused
            pl.BlockSpec((1, num_classes), lambda i: (0, 0)),  # bias, reused
        ],
        out_specs=pl.BlockSpec((block_m, num_classes), lambda i: (i, 0)),
        compiler_params=pltpu.CompilerParams(
            dimension_semantics=("parallel",),
        ),
    )(x_flat, w, b)


if __name__ == "__main__":
    # Shapes consistent with the module: x is a conv-backbone output
    # (batch, final_out_channels, features_len); the classifier flattens it.
    batch, final_out_channels, features_len = 2, 4, 16
    num_classes = 8
    in_features = final_out_channels * features_len  # 64

    key = jax.random.PRNGKey(0)
    kx, kw, kb = jax.random.split(key, 3)
    x = jax.random.normal(kx, (batch, final_out_channels, features_len), dtype=jnp.float32)
    weight = jax.random.normal(kw, (num_classes, in_features), dtype=jnp.float32) * 0.1
    bias = jax.random.normal(kb, (num_classes,), dtype=jnp.float32) * 0.1

    y = classifier_forward(x, weight, bias)
    y = jax.block_until_ready(y)

    # Pure-JAX reference of the PyTorch forward.
    y_ref = x.reshape(batch, -1) @ weight.T + bias

    assert y.shape == (batch, num_classes) and y.dtype == x.dtype
    assert jnp.allclose(y, y_ref, atol=1e-5, rtol=1e-5)
    print("KERNEL_OK")
</pallas_src>

<mosaic_0001>
module attributes {stable_mosaic.version = 11 : i64} {
  func.func @_linear_kernel(%arg0: i32, %arg1: memref<2x64xf32, #tpu.memory_space<vmem>>, %arg2: memref<64x8xf32, #tpu.memory_space<vmem>>, %arg3: memref<1x8xf32, #tpu.memory_space<vmem>>, %arg4: memref<2x8xf32, #tpu.memory_space<vmem>>) attributes {dimension_semantics = [#tpu.dimension_semantics<parallel>], iteration_bounds = array<i64: 1>, scalar_prefetch = 0 : i64, scratch_operands = 0 : i64, tpu.core_type = #tpu.core_type<tc>, window_params = [{transform_indices = @transform_0, window_bounds = array<i64: 2, 64>}, {pipeline_mode = #tpu.pipeline_mode<synchronous>, transform_indices = @transform_1, window_bounds = array<i64: 64, 8>}, {pipeline_mode = #tpu.pipeline_mode<synchronous>, transform_indices = @transform_2, window_bounds = array<i64: 1, 8>}, {transform_indices = @transform_3, window_bounds = array<i64: 2, 8>}]} {
    %c0 = arith.constant 0 : index
    %c0_0 = arith.constant 0 : index
    %0 = vector.load %arg1[%c0, %c0_0] : memref<2x64xf32, #tpu.memory_space<vmem>>, vector<2x64xf32>
    %c0_1 = arith.constant 0 : index
    %c0_2 = arith.constant 0 : index
    %1 = vector.load %arg2[%c0_1, %c0_2] : memref<64x8xf32, #tpu.memory_space<vmem>>, vector<64x8xf32>
    %cst = arith.constant dense<0.000000e+00> : vector<2x8xf32>
    %2 = tpu.matmul %0, %1, %cst {dimension_numbers = #tpu.dot_dimension_numbers<[1], [0], [0], [1], [0, 0, 1, 1], [], []>} : vector<2x64xf32>, vector<64x8xf32>, vector<2x8xf32> -> vector<2x8xf32>
    %c0_3 = arith.constant 0 : index
    %c0_4 = arith.constant 0 : index
    %3 = vector.load %arg3[%c0_3, %c0_4] : memref<1x8xf32, #tpu.memory_space<vmem>>, vector<1x8xf32>
    %4 = vector.broadcast %3 : vector<1x8xf32> to vector<2x8xf32>
    %5 = arith.addf %2, %4 : vector<2x8xf32>
    %c0_5 = arith.constant 0 : index
    %c0_6 = arith.constant 0 : index
    %6 = vector.load %arg4[%c0_5, %c0_6] : memref<2x8xf32, #tpu.memory_space<vmem>>, vector<2x8xf32>
    tpu.vector_store %arg4[%c0_5, %c0_6], %5 {strides = array<i32>} : memref<2x8xf32, #tpu.memory_space<vmem>>, vector<2x8xf32>,
    return
  }
  func.func @transform_0(%arg0: i32) -> (i32, i32) {
    %c0_i32 = arith.constant 0 : i32
    %c0_i32_0 = arith.constant 0 : i32
    return %arg0, %c0_i32 : i32, i32
  }
  func.func @transform_1(%arg0: i32) -> (i32, i32) {
    %c0_i32 = arith.constant 0 : i32
    %c0_i32_0 = arith.constant 0 : i32
    %c0_i32_1 = arith.constant 0 : i32
    return %c0_i32, %c0_i32_0 : i32, i32
  }
  func.func @transform_2(%arg0: i32) -> (i32, i32) {
    %c0_i32 = arith.constant 0 : i32
    %c0_i32_0 = arith.constant 0 : i32
    %c0_i32_1 = arith.constant 0 : i32
    return %c0_i32, %c0_i32_0 : i32, i32
  }
  func.func @transform_3(%arg0: i32) -> (i32, i32) {
    %c0_i32 = arith.constant 0 : i32
    %c0_i32_0 = arith.constant 0 : i32
    return %arg0, %c0_i32 : i32, i32
  }
}

</mosaic_0001>

<bundles_post_ra>
// kernel: tpu_custom_call.1
= control target key start
LH: loop header
LB: loop body
LE: loop exit
PB: predicated region body
PF: predicated region fallthrough
CT: control target
= control target key end

     0   :  { %s153_s0 = inlined_call_operand.vmem [shape: f32[2,64], index: 0, kind: input, shape index: {}]   ;;  %s154_s1 = inlined_call_operand.vmem [shape: f32[64,8], index: 1, kind: input, shape index: {}]   ;;  %s155_s2 = inlined_call_operand.vmem [shape: f32[1,8], index: 2, kind: input, shape index: {}]   ;;  %s156_s3 = inlined_call_operand.hbm [shape: f32[2,8], index: 3, kind: output, shape index: {}]  }
   0x1   :  { %v23_v0 = vld [vmem:[%s154_s1 + $0x38] sm:$0xff]  ;;  %v22_v1 = vld [vmem:[%s154_s1 + $0x30] sm:$0xff]  ;;  %v21_v2 = vld [vmem:[%s154_s1 + $0x28] sm:$0xff] }
   0x2   :  { %40 = vmatpush.msra.mxu0 %v23_v0 }
   0x4   :  { %41 = vmatpush.msra.mxu0 %v22_v1 }
   0x5   :  { %8 = vsyncpa [#allocation3], 0  ;;  %v20_v3 = vld [vmem:[%s154_s1 + $0x20] sm:$0xff]  ;;  %v19_v4 = vld [vmem:[%s154_s1 + $0x18] sm:$0xff]  ;;  %vm28_vm0 = vcmask 523264   ;;  %s99_s5 = smov [#allocation2]  }
   0x6   :  { %42 = vmatpush.msra.mxu0 %v21_v2  ;;  %v18_v5 = vld [vmem:[%s154_s1 + $0x10] sm:$0xff]  ;;  %v17_v6 = vld [vmem:[%s154_s1 + $0x8] sm:$0xff]  ;;  %v16_v7 = vld [vmem:[%s154_s1] sm:$0xff]  ;;  %s59_s6 = sshll.u32 %s99_s5, 4  ;;  %s61_s9 = sshll.u32 %s156_s3, 4  ;;  %vm52_vm1 = vcmask 58368   ;;  %s60_s6 = int_to_ptr.vmem [resolvable:$true] %s59_s6  ;;  %s62_s9 = int_to_ptr.hbm [resolvable:$true] %s61_s9 }
   0x7   :  { %v15_v8 = vld [vmem:[%s153_s0] sm:$0x3] }
   0x8   :  { %43 = vmatpush.msra.mxu0 %v20_v3  ;;  %v72_v9 = vld [vmem:[%s155_s2] ss:$0 sm:$0xff] }
   0xa   :  { %44 = vmatpush.msra.mxu0 %v19_v4 }
   0xc   :  { %45 = vmatpush.msra.mxu0 %v18_v5 }
   0xe   :  { %46 = vmatpush.msra.mxu0 %v17_v6 }
  0x10   :  { %47 = vmatpush.msra.mxu0 %v16_v7 }
  0x11   :  { %70 = vmatmul.msk.f32.vlgmr.msra.gmra.mxu0 %vm28_vm0, %v15_v8 }
  0x8e   :  { %v49_v10 = vpop.f32.mrf.mxu0 }
  0x8f   :  { %v50_v11 = vadd.f32 %v72_v9, %v49_v10 }
  0x91   :  { %53 = vst.msk [vmem:[#allocation2] sm:$0x3] %vm52_vm1, %v50_v11 }
  0x92   :  { %64 = dma.vmem_to_hbm [thread:$0]  %s60_s6, 32, %s62_s9, [#allocation3]  }
  0x93   :  { %97 = dma.done.wait [#allocation3], 32  }
  0x94   :  { %98 = vsyncadd [#allocation3], 4294967264 }
  0x95   :  { %69 = vsyncpa [#allocation3], 1 }

</bundles_post_ra>
